<compile_context>
chip_gen: v6e
topology: v6e:2x2x1
jax: 0.10.0
libtpu: 0.0.40
codegen_flags: <defaults>
</compile_context>

<pallas_src>
import jax
import jax.numpy as jnp
from jax.experimental import pallas as pl
from jax.experimental.pallas import tpu as pltpu


def _round_up(n, m):
    return ((n + m - 1) // m) * m


def mlp_kernel(x_ref, w1_ref, b1_ref, w2_ref, b2_ref, w3_ref, b3_ref, o_ref):
    # Layer 1 (MXU): (TB, D) @ (D, 64), bf16 operands, f32 accumulation.
    h1 = jnp.dot(x_ref[...], w1_ref[...], preferred_element_type=jnp.float32)
    h1 = jnp.maximum(h1 + b1_ref[...], 0.0)

    # Dropout(0.2): identity at inference time (eval-mode forward).

    # Layer 2 (MXU): (TB, 64) @ (64, 32), bf16 operands, f32 accumulation.
    h2 = jnp.dot(h1.astype(jnp.bfloat16), w2_ref[...],
                 preferred_element_type=jnp.float32)
    h2 = jnp.maximum(h2 + b2_ref[...], 0.0)

    # Layer 3 (VPU mul + XLU cross-lane reduce): N=1 matmul replaced by a
    # broadcasted multiply with the (1, 32) weight row and a sum over lanes.
    out = jnp.sum(h2 * w3_ref[...], axis=-1) + b3_ref[0, 0]      # (TB,) f32

    # Lane-dense store: batch rows live on the lane axis of the output block.
    o_ref[...] = out.reshape(1, o_ref.shape[1]).astype(o_ref.dtype)


def mlp_forward(x, params, *, tb=512):
    """x: (B, input_dim) f32. params: (w1,b1,w2,b2,w3,b3) with weights stored (in,out)."""
    w1, b1, w2, b2, w3, b3 = params
    B, D = x.shape

    # Batch tile: multiple of 8 (sublanes); capped by the (padded) batch size.
    TB = min(_round_up(tb, 8), _round_up(B, 8))
    num_tiles = pl.cdiv(B, TB)
    B_pad = num_tiles * TB
    if B_pad != B:
        x = jnp.pad(x, ((0, B_pad - B), (0, 0)))

    # bf16 MXU operands, f32 everywhere else.
    x_bf = x.astype(jnp.bfloat16)
    w1_bf = w1.astype(jnp.bfloat16)
    w2_bf = w2.astype(jnp.bfloat16)
    b1_f = b1.astype(jnp.float32)                       # (1, 64)
    b2_f = b2.astype(jnp.float32)                       # (1, 32)
    w3_row = w3.reshape(1, w3.shape[0]).astype(jnp.float32)   # (1, 32)
    b3_s = b3.reshape(1, 1).astype(jnp.float32)         # (1, 1) scalar in SMEM

    resident = lambda i: (0, 0)   # weights/biases: constant block -> stay in VMEM

    out = pl.pallas_call(
        mlp_kernel,
        out_shape=jax.ShapeDtypeStruct((num_tiles, TB), jnp.float32),
        grid=(num_tiles,),
        in_specs=[
            pl.BlockSpec((TB, D), lambda i: (i, 0)),        # x tile (pipelined)
            pl.BlockSpec(w1_bf.shape, resident),            # (D, 64)
            pl.BlockSpec(b1_f.shape, resident),             # (1, 64)
            pl.BlockSpec(w2_bf.shape, resident),            # (64, 32)
            pl.BlockSpec(b2_f.shape, resident),             # (1, 32)
            pl.BlockSpec(w3_row.shape, resident),           # (1, 32)
            pl.BlockSpec(memory_space=pltpu.MemorySpace.SMEM),  # b3 scalar
        ],
        out_specs=pl.BlockSpec((1, TB), lambda i: (i, 0)),  # lane-dense output slab
        compiler_params=pltpu.CompilerParams(
            dimension_semantics=("parallel",),
            vmem_limit_bytes=32 * 1024 * 1024,
        ),
    )(x_bf, w1_bf, b1_f, w2_bf, b2_f, w3_row, b3_s)

    return out.reshape(-1)[:B].reshape(B, 1)


def init_params(key, input_dim):
    # PyTorch nn.Linear default init: U(-1/sqrt(fan_in), 1/sqrt(fan_in)).
    # Weights stored as (in, out) (transposed vs torch's (out, in)).
    dims = [(input_dim, 64), (64, 32), (32, 1)]
    params = []
    for fan_in, fan_out in dims:
        key, kw, kb = jax.random.split(key, 3)
        bound = 1.0 / jnp.sqrt(float(fan_in))
        w = jax.random.uniform(kw, (fan_in, fan_out), jnp.float32, -bound, bound)
        b = jax.random.uniform(kb, (1, fan_out), jnp.float32, -bound, bound)
        params.extend([w, b])
    return tuple(params)


def reference_forward(x, params):
    # Mirrors the kernel's dtype scheme: bf16 matmul operands, f32 accumulation.
    w1, b1, w2, b2, w3, b3 = params
    h1 = jnp.dot(x.astype(jnp.bfloat16), w1.astype(jnp.bfloat16),
                 preferred_element_type=jnp.float32) + b1
    h1 = jnp.maximum(h1, 0.0)
    h2 = jnp.dot(h1.astype(jnp.bfloat16), w2.astype(jnp.bfloat16),
                 preferred_element_type=jnp.float32) + b2
    h2 = jnp.maximum(h2, 0.0)
    return h2 @ w3 + b3


if __name__ == "__main__":
    key = jax.random.PRNGKey(0)
    k_x, k_x2, k_p = jax.random.split(key, 3)

    batch, input_dim = 8, 16
    params = init_params(k_p, input_dim)

    # Small single-tile case.
    x = jax.random.normal(k_x, (batch, input_dim), jnp.float32)
    out = jax.block_until_ready(mlp_forward(x, params))
    ref = reference_forward(x, params)
    assert out.shape == (batch, 1)
    assert jnp.allclose(out, ref, atol=1e-3, rtol=1e-3)

    # Multi-tile case with a padded tail (exercises the batch grid + padding).
    batch2 = 300
    x2 = jax.random.normal(k_x2, (batch2, input_dim), jnp.float32)
    out2 = jax.block_until_ready(mlp_forward(x2, params, tb=128))
    ref2 = reference_forward(x2, params)
    assert out2.shape == (batch2, 1)
    assert jnp.allclose(out2, ref2, atol=1e-3, rtol=1e-3)

    print("KERNEL_OK")
</pallas_src>

<mosaic_0001>
module attributes {stable_mosaic.version = 11 : i64} {
  func.func @mlp_kernel(%arg0: i32, %arg1: memref<8x16xbf16, #tpu.memory_space<vmem>>, %arg2: memref<16x64xbf16, #tpu.memory_space<vmem>>, %arg3: memref<1x64xf32, #tpu.memory_space<vmem>>, %arg4: memref<64x32xbf16, #tpu.memory_space<vmem>>, %arg5: memref<1x32xf32, #tpu.memory_space<vmem>>, %arg6: memref<1x32xf32, #tpu.memory_space<vmem>>, %arg7: memref<1x1xf32, #tpu.memory_space<smem>>, %arg8: memref<1x8xf32, #tpu.memory_space<vmem>>) attributes {dimension_semantics = [#tpu.dimension_semantics<parallel>], iteration_bounds = array<i64: 1>, scalar_prefetch = 0 : i64, scratch_operands = 0 : i64, tpu.core_type = #tpu.core_type<tc>, window_params = [{transform_indices = @transform_0, window_bounds = array<i64: 8, 16>}, {pipeline_mode = #tpu.pipeline_mode<synchronous>, transform_indices = @transform_1, window_bounds = array<i64: 16, 64>}, {pipeline_mode = #tpu.pipeline_mode<synchronous>, transform_indices = @transform_2, window_bounds = array<i64: 1, 64>}, {pipeline_mode = #tpu.pipeline_mode<synchronous>, transform_indices = @transform_3, window_bounds = array<i64: 64, 32>}, {pipeline_mode = #tpu.pipeline_mode<synchronous>, transform_indices = @transform_4, window_bounds = array<i64: 1, 32>}, {pipeline_mode = #tpu.pipeline_mode<synchronous>, transform_indices = @transform_5, window_bounds = array<i64: 1, 32>}, {transform_indices = @transform_6, window_bounds = array<i64: 1, 1>}, {transform_indices = @transform_7, window_bounds = array<i64: 1, 8>}]} {
    %c0 = arith.constant 0 : index
    %c0_0 = arith.constant 0 : index
    %0 = vector.load %arg1[%c0, %c0_0] : memref<8x16xbf16, #tpu.memory_space<vmem>>, vector<8x16xbf16>
    %c0_1 = arith.constant 0 : index
    %c0_2 = arith.constant 0 : index
    %1 = vector.load %arg2[%c0_1, %c0_2] : memref<16x64xbf16, #tpu.memory_space<vmem>>, vector<16x64xbf16>
    %cst = arith.constant dense<0.000000e+00> : vector<8x64xf32>
    %2 = tpu.matmul %0, %1, %cst {dimension_numbers = #tpu.dot_dimension_numbers<[1], [0], [0], [1], [0, 0, 1, 1], [], []>} : vector<8x16xbf16>, vector<16x64xbf16>, vector<8x64xf32> -> vector<8x64xf32>
    %c0_3 = arith.constant 0 : index
    %c0_4 = arith.constant 0 : index
    %3 = vector.load %arg3[%c0_3, %c0_4] : memref<1x64xf32, #tpu.memory_space<vmem>>, vector<1x64xf32>
    %4 = vector.broadcast %3 : vector<1x64xf32> to vector<8x64xf32>
    %5 = arith.addf %2, %4 : vector<8x64xf32>
    %cst_5 = arith.constant 0.000000e+00 : f32
    %6 = vector.broadcast %cst_5 : f32 to vector<8x64xf32>
    %7 = arith.maximumf %5, %6 : vector<8x64xf32>
    %8 = arith.truncf %7 : vector<8x64xf32> to vector<8x64xbf16>
    %c0_6 = arith.constant 0 : index
    %c0_7 = arith.constant 0 : index
    %9 = vector.load %arg4[%c0_6, %c0_7] : memref<64x32xbf16, #tpu.memory_space<vmem>>, vector<64x32xbf16>
    %cst_8 = arith.constant dense<0.000000e+00> : vector<8x32xf32>
    %10 = tpu.matmul %8, %9, %cst_8 {dimension_numbers = #tpu.dot_dimension_numbers<[1], [0], [0], [1], [0, 0, 1, 1], [], []>} : vector<8x64xbf16>, vector<64x32xbf16>, vector<8x32xf32> -> vector<8x32xf32>
    %c0_9 = arith.constant 0 : index
    %c0_10 = arith.constant 0 : index
    %11 = vector.load %arg5[%c0_9, %c0_10] : memref<1x32xf32, #tpu.memory_space<vmem>>, vector<1x32xf32>
    %12 = vector.broadcast %11 : vector<1x32xf32> to vector<8x32xf32>
    %13 = arith.addf %10, %12 : vector<8x32xf32>
    %cst_11 = arith.constant 0.000000e+00 : f32
    %14 = vector.broadcast %cst_11 : f32 to vector<8x32xf32>
    %15 = arith.maximumf %13, %14 : vector<8x32xf32>
    %c0_12 = arith.constant 0 : index
    %c0_13 = arith.constant 0 : index
    %16 = vector.load %arg6[%c0_12, %c0_13] : memref<1x32xf32, #tpu.memory_space<vmem>>, vector<1x32xf32>
    %17 = vector.broadcast %16 : vector<1x32xf32> to vector<8x32xf32>
    %18 = arith.mulf %15, %17 : vector<8x32xf32>
    %cst_14 = arith.constant dense<0.000000e+00> : vector<8xf32>
    %19 = vector.multi_reduction <add>, %18, %cst_14 [1] : vector<8x32xf32> to vector<8xf32>
    %c0_15 = arith.constant 0 : index
    %c0_16 = arith.constant 0 : index
    %20 = memref.load %arg7[%c0_15, %c0_16] : memref<1x1xf32, #tpu.memory_space<smem>>
    %21 = vector.broadcast %20 : f32 to vector<8xf32>
    %22 = arith.addf %19, %21 : vector<8xf32>
    %23 = vector.shape_cast %22 : vector<8xf32> to vector<1x8xf32>
    %c0_17 = arith.constant 0 : index
    %c0_18 = arith.constant 0 : index
    %24 = vector.load %arg8[%c0_17, %c0_18] : memref<1x8xf32, #tpu.memory_space<vmem>>, vector<1x8xf32>
    tpu.vector_store %arg8[%c0_17, %c0_18], %23 {strides = array<i32>} : memref<1x8xf32, #tpu.memory_space<vmem>>, vector<1x8xf32>,
    return
  }
  func.func @transform_0(%arg0: i32) -> (i32, i32) {
    %c0_i32 = arith.constant 0 : i32
    %c0_i32_0 = arith.constant 0 : i32
    return %arg0, %c0_i32 : i32, i32
  }
  func.func @transform_1(%arg0: i32) -> (i32, i32) {
    %c0_i32 = arith.constant 0 : i32
    %c0_i32_0 = arith.constant 0 : i32
    %c0_i32_1 = arith.constant 0 : i32
    return %c0_i32, %c0_i32_0 : i32, i32
  }
  func.func @transform_2(%arg0: i32) -> (i32, i32) {
    %c0_i32 = arith.constant 0 : i32
    %c0_i32_0 = arith.constant 0 : i32
    %c0_i32_1 = arith.constant 0 : i32
    return %c0_i32, %c0_i32_0 : i32, i32
  }
  func.func @transform_3(%arg0: i32) -> (i32, i32) {
    %c0_i32 = arith.constant 0 : i32
    %c0_i32_0 = arith.constant 0 : i32
    %c0_i32_1 = arith.constant 0 : i32
    return %c0_i32, %c0_i32_0 : i32, i32
  }
  func.func @transform_4(%arg0: i32) -> (i32, i32) {
    %c0_i32 = arith.constant 0 : i32
    %c0_i32_0 = arith.constant 0 : i32
    %c0_i32_1 = arith.constant 0 : i32
    return %c0_i32, %c0_i32_0 : i32, i32
  }
  func.func @transform_5(%arg0: i32) -> (i32, i32) {
    %c0_i32 = arith.constant 0 : i32
    %c0_i32_0 = arith.constant 0 : i32
    %c0_i32_1 = arith.constant 0 : i32
    return %c0_i32, %c0_i32_0 : i32, i32
  }
  func.func @transform_6(%arg0: i32) -> (i32, i32) {
    %c0_i32 = arith.constant 0 : i32
    %c0_i32_0 = arith.constant 0 : i32
    %c0_i32_1 = arith.constant 0 : i32
    return %c0_i32, %c0_i32_0 : i32, i32
  }
  func.func @transform_7(%arg0: i32) -> (i32, i32) {
    %c0_i32 = arith.constant 0 : i32
    %c0_i32_0 = arith.constant 0 : i32
    return %arg0, %c0_i32 : i32, i32
  }
}

</mosaic_0001>

<bundles_post_ra>
// kernel: tpu_custom_call.1
= control target key start
LH: loop header
LB: loop body
LE: loop exit
PB: predicated region body
PF: predicated region fallthrough
CT: control target
= control target key end

     0   :  { %v279_v1 = vmov 0.0   ;;  %vm280_vm0 = vmmov 0   ;;  %vm45_vm1 = vcmask 130048   ;;  %s355_s0 = inlined_call_operand.vmem [shape: bf16[8,16], index: 0, kind: input, shape index: {}]   ;;  %s356_s1 = inlined_call_operand.vmem [shape: bf16[16,64], index: 1, kind: input, shape index: {}]   ;;  %s357_s2 = inlined_call_operand.vmem [shape: f32[1,64], index: 2, kind: input, shape index: {}]   ;;  %s358_s3 = inlined_call_operand.vmem [shape: bf16[64,32], index: 3, kind: input, shape index: {}]   ;;  %s359_s4 = inlined_call_operand.vmem [shape: f32[1,32], index: 4, kind: input, shape index: {}]   ;;  %s360_s5 = inlined_call_operand.vmem [shape: f32[1,32], index: 5, kind: input, shape index: {}]   ;;  %s361_s6 = inlined_call_operand.<no memory space> [shape: f32[1,1], index: 6, kind: input, shape index: {}]   ;;  %s362_s7 = inlined_call_operand.hbm [shape: f32[1,8], index: 7, kind: output, shape index: {}]  }
   0x1   :  { %v252_v0 = vld [vmem:[%s356_s1] sm:$0xff]   ;;  %231 = vmatprep.subr.bf16.mxu0 %v279_v1  ;;  %237 = vmatprep.subr.bf16.mxu1 %v279_v1  ;;  %v253_v3 = vld [vmem:[%s358_s3 + $0x18] sm:$0xff]   ;;  %v254_v4 = vld [vmem:[%s358_s3 + $0x10] sm:$0xff]  }
   0x2   :  { %v29_v2 = vld [vmem:[%s355_s0] sm:$0xf]  ;;  %232 = vmatpush3.bf16.msra.mxu0 %v252_v0  ;;  %233 = vmatprep.mubr.msk.bf16.mxu0 %vm280_vm0, %v279_v1 }
   0x3   :  { %245 = vmatprep.mubr.msk.bf16.mxu1 %vm280_vm0, %v279_v1  ;;  %238 = vmatpush3.bf16.msra.mxu1 %v253_v3 }
   0x4   :  { %239 = vmatprep.subr.bf16.mxu1 %v279_v1 }
   0x5   :  { %234 = vmatmul.mubr.msk.bf16.vlgmr.msra.gmra.mxu0 %vm45_vm1, %v29_v2 }
   0x6   :  { %13 = vsyncpa [#allocation4], 0  ;;  %v255_v5 = vld [vmem:[%s358_s3 + $0x8] sm:$0xff]   ;;  %v256_v6 = vld [vmem:[%s358_s3] sm:$0xff]   ;;  %vm130_vm2 = vcmask 523264   ;;  %vm183_vm3 = vcmask 261120   ;;  %v191_v25 = vlaneseq  ;;  %v188_v28 = vstv %s361_s6 }
   0x7   :  { %240 = vmatpush3.bf16.msra.mxu1 %v254_v4  ;;  %v214_v7 = vld [vmem:[%s357_s2] ss:$0 sm:$0xff]  ;;  %vm198_vm4 = vcmask 57344  }
   0x8   :  { %241 = vmatprep.subr.bf16.mxu1 %v279_v1  ;;  %v217_v15 = vld [vmem:[%s359_s4] ss:$0 sm:$0xff]  ;;  %v192_v26 = vand.u32 127, %v191_v25  ;;  %v194_v27 = vshrl.u32 %v191_v25, 7  ;;  %s281_s4 = smov [#allocation3]  }
   0x9   :  { %v223_v19 = vld [vmem:[%s360_s5] ss:$0 sm:$0xff]  ;;  %s206_s17 = sshll.u32 %s281_s4, 4  ;;  %s207_s17 = int_to_ptr.vmem [resolvable:$true] %s206_s17 }
   0xa   :  { %v195_v29 = vsub.s32 %v192_v26, %v194_v27  ;;  %s257_s5 = scalar_lea.vmem %s207_s17, 16  ;;  %s261_s18 = scalar_lea.vmem %s207_s17, 32 }
   0xb   :  { %242 = vmatpush3.bf16.msra.mxu1 %v255_v5  ;;  %p258_p0 = scmp.ne.s32.totalorder %s207_s17, %s257_s5  ;;  %p262_p1 = scmp.lt.s32.totalorder %s207_s17, %s207_s17 }
   0xc   :  { %243 = vmatprep.subr.bf16.mxu1 %v279_v1  ;;  %p263_p2 = scmp.lt.s32.totalorder %s261_s18, %s257_s5 }
   0xe   :  { %p264_p3 = por %p263_p2, %p262_p1 }
   0xf   :  { %244 = vmatpush3.bf16.msra.mxu1 %v256_v6 }
  0x10   :  { %p265_p4 = pnand %p264_p3, %p258_p0 }
  0xc5   :  { %v83_v8 = vpop.f32.mrf.mxu0 }
  0xc6   :  { %v84_v9 = vadd.f32 %v214_v7, %v83_v8 }
  0xc7   :  { %v235_v10 = vpop.f32.mrf.mxu0 }
  0xc8   :  { %v89_v11 = vmax.f32 %v84_v9, 0.0 }
  0xc9   :  { %v86_v12 = vpop.f32.mrf.mxu0 }
  0xca   :  { %v90_v13 = vpack.c.bf16 %v89_v11, %v89_v11 }
  0xcb   :  { %v236_v14 = vpop.f32.mrf.mxu0 }
  0xcc   :  { %246 = vmatmul.mubr.msk.bf16.vlgmr.msra.gmra.mxu1 %vm130_vm2, %v90_v13 }
 0x18c   :  { %v168_v16 = vpop.f32.mrf.mxu1 }
 0x18d   :  { %v169_v17 = vadd.f32 %v217_v15, %v168_v16 }
 0x18e   :  { %v247_v18 = vpop.f32.mrf.mxu1 }
 0x18f   :  { %v174_v20 = vmax.f32 %v169_v17, 0.0 }
 0x190   :  { %v171_v21 = vpop.f32.mrf.mxu1 }
 0x191   :  { %v182_v22 = vmul.f32 %v223_v19, %v174_v20 }
 0x192   :  { %v248_v23 = vpop.f32.mrf.mxu1 }
 0x193   :  { %v184_v24 = vsel %vm183_vm3, %v182_v22, 0.0 }
 0x194   :  { %185 = vadd.xlane.f32.xlu0 %v184_v24 }
 0x21d   :  { %v186_v30 = vpop.xlane.xlu0 %185 }
 0x21e   :  { %v189_v31 = vadd.f32 %v188_v28, %v186_v30 }
 0x220   :  { %v196_v32 = vrot.slane %v189_v31, %v195_v29 }
 0x222   :  { %199 = vst.msk [vmem:[#allocation3] sm:$0x1] %vm198_vm4, %v196_v32 }
 0x223   :  { %268 = shalt.err (!%p265_p4)
}
 0x224   :  { %209 = dma.vmem_to_hbm [thread:$0]  %s207_s17, 16, %s362_s7, [#allocation4]  }
 0x225   :  { %277 = dma.done.wait [#allocation4], 16  }
 0x226   :  { %278 = vsyncadd [#allocation4], 4294967280 }
 0x227   :  { %213 = vsyncpa [#allocation4], 1 }

</bundles_post_ra>
